<compile_context>
chip_gen: v6e
topology: v6e:2x2x1
jax: 0.10.0
libtpu: 0.0.40
codegen_flags: <defaults>
</compile_context>

<pallas_src>
import functools

import jax
import jax.numpy as jnp
from jax.experimental import pallas as pl
from jax.experimental.pallas import tpu as pltpu

_LANE = 128      # TPU lane width (last-dim tiling)
_SUBLANE = 8     # f32 sublane width (second-to-last dim tiling)
_VAR_EPS = 1e-6


def _round_up(n, m):
    return ((n + m - 1) // m) * m


def _silu(x):
    # sigmoid(x) == 0.5 * (1 + tanh(x/2)) exactly; tanh goes to the EUP slot
    # (no VPU divide), keeping the VALU slot free for bias/select filler.
    return x * (0.5 * (1.0 + jnp.tanh(0.5 * x)))


def _softplus(x):
    # numerically stable softplus
    return jnp.maximum(x, 0.0) + jnp.log1p(jnp.exp(-jnp.abs(x)))


def _mlp_kernel(x_ref,
                w1_ref, b1_ref,
                w2_ref, b2_ref,
                w3_ref, b3_ref,
                wh_ref, bh_ref,
                mean_ref, var_ref,
                *, output_dim, compute_dtype):
    """One batch tile: 3-layer SiLU trunk + fused (mean|var) head, narrow outputs."""
    x = x_ref[...]

    # Hoisted bias loads (broadcast once; JAX does not CSE broadcast_in_dim).
    b1 = b1_ref[...]
    b2 = b2_ref[...]
    b3 = b3_ref[...]
    bh = bh_ref[...]

    def dense(h, w_ref, b, op_dtype):
        # MXU operands in op_dtype, f32 accumulation, f32 bias add / elementwise.
        lhs = h.astype(op_dtype)
        return jnp.dot(lhs, w_ref[...], preferred_element_type=jnp.float32) + b

    # trunk (dropout is identity in eval mode); bf16 MXU operands by default
    h = _silu(dense(x, w1_ref, b1, compute_dtype))
    h = _silu(dense(h, w2_ref, b2, compute_dtype))
    h = _silu(dense(h, w3_ref, b3, compute_dtype))

    # fused mean|var head: single lane-dense [TB, 128*] matmul held only in VMEM.
    # Head stays f32 (tiny FLOPs) so bf16 adds no extra error on the regression mean.
    raw = dense(h, wh_ref, bh, jnp.float32)

    mean = raw[:, :output_dim]
    log_var = raw[:, output_dim:2 * output_dim]
    var = _softplus(log_var) + _VAR_EPS          # softplus only on the narrow slice

    mean_ref[...] = mean.astype(mean_ref.dtype)
    var_ref[...] = var.astype(var_ref.dtype)


def pack_params(params, compute_dtype=jnp.bfloat16):
    """Zero-pad hidden features to the 128-lane width and fuse the mean/var heads.

    Trunk weights are cast to compute_dtype (bf16 default); head weights and all
    biases stay f32 (added / used after f32 accumulation).  The input feature dim
    is intentionally NOT padded (MXU handles K < 128 correctly).
    """
    input_dim, hidden_dim = params["w1"].shape
    output_dim = params["wm"].shape[1]

    hp = _round_up(max(hidden_dim, 1), _LANE)
    op = _round_up(max(2 * output_dim, 1), _LANE)

    def pad(w, rows, cols, dtype):
        out = jnp.zeros((rows, cols), jnp.float32)
        out = out.at[:w.shape[0], :w.shape[1]].set(w)
        return out.astype(dtype)

    w_head = jnp.concatenate([params["wm"], params["wv"]], axis=1)   # [H, 2*out]
    b_head = jnp.concatenate([params["bm"], params["bv"]], axis=1)   # [1, 2*out]

    packed = dict(
        w1=pad(params["w1"], input_dim, hp, compute_dtype), b1=pad(params["b1"], 1, hp, jnp.float32),
        w2=pad(params["w2"], hp, hp, compute_dtype),        b2=pad(params["b2"], 1, hp, jnp.float32),
        w3=pad(params["w3"], hp, hp, compute_dtype),        b3=pad(params["b3"], 1, hp, jnp.float32),
        wh=pad(w_head, hp, op, jnp.float32),                bh=pad(b_head, 1, op, jnp.float32),
    )
    dims = dict(input_dim=input_dim, hidden_dim=hidden_dim, output_dim=output_dim,
                hp=hp, op=op)
    return packed, dims


def material_property_predictor(x, params, *, compute_dtype=jnp.bfloat16, batch_tile=4096):
    """x: [batch, input_dim] float32. params: raw (unpadded) weights. Returns dict."""
    batch, input_dim = x.shape
    packed, dims = pack_params(params, compute_dtype)
    assert dims["input_dim"] == input_dim
    output_dim = dims["output_dim"]
    hp, op = dims["hp"], dims["op"]

    # Adaptive batch tile: each tile <= batch_tile rows, rounded to the f32 sublane.
    full = _round_up(batch, _SUBLANE)
    n_tiles = max(1, pl.cdiv(full, max(_round_up(batch_tile, _SUBLANE), _SUBLANE)))
    # v7x megacore: when the whole batch would fit in one tile, split in two so the
    # "parallel" grid axis actually lands on both TensorCores.
    if n_tiles == 1 and full >= 2 * _SUBLANE:
        n_tiles = 2
    tb = _round_up(pl.cdiv(full, n_tiles), _SUBLANE)
    bp = _round_up(batch, tb)

    # No feature-dim padding; only pad batch rows when needed (padded rows produce
    # finite garbage from the biases and are sliced off below).
    if bp == batch:
        x_in = x
    else:
        x_in = jnp.zeros((bp, input_dim), x.dtype).at[:batch].set(x)

    grid = (bp // tb,)

    def resident(shape):
        # Weights/biases: same block for every grid step -> stays VMEM-resident.
        return pl.BlockSpec(shape, lambda i: (0, 0))

    kernel = functools.partial(_mlp_kernel,
                               output_dim=output_dim,
                               compute_dtype=compute_dtype)

    mean, var = pl.pallas_call(
        kernel,
        out_shape=(
            jax.ShapeDtypeStruct((bp, output_dim), jnp.float32),
            jax.ShapeDtypeStruct((bp, output_dim), jnp.float32),
        ),
        grid=grid,
        in_specs=[
            pl.BlockSpec((tb, input_dim), lambda i: (i, 0)),   # x: tiled over batch, unpadded K
            resident((input_dim, hp)), resident((1, hp)),      # layer 1
            resident((hp, hp)), resident((1, hp)),             # layer 2
            resident((hp, hp)), resident((1, hp)),             # layer 3
            resident((hp, op)), resident((1, op)),             # fused mean|var head
        ],
        out_specs=(
            pl.BlockSpec((tb, output_dim), lambda i: (i, 0)),  # mean: narrow writeback
            pl.BlockSpec((tb, output_dim), lambda i: (i, 0)),  # var:  narrow writeback
        ),
        compiler_params=pltpu.CompilerParams(
            # batch axis is embarrassingly parallel -> shard across v7x's 2 TCs
            dimension_semantics=("parallel",),
        ),
    )(
        x_in,
        packed["w1"], packed["b1"],
        packed["w2"], packed["b2"],
        packed["w3"], packed["b3"],
        packed["wh"], packed["bh"],
    )

    if bp != batch:
        mean = mean[:batch]
        var = var[:batch]
    return {"mean": mean, "var": var}


def init_params(key, input_dim, hidden_dim, output_dim):
    """Deterministic PyTorch-Linear-style init: U(-1/sqrt(fan_in), 1/sqrt(fan_in)).
    Weights stored [in_features, out_features]; biases stored [1, out_features]."""
    def linear(k, fan_in, fan_out):
        kw, kb = jax.random.split(k)
        bound = 1.0 / jnp.sqrt(fan_in)
        w = jax.random.uniform(kw, (fan_in, fan_out), jnp.float32, -bound, bound)
        b = jax.random.uniform(kb, (1, fan_out), jnp.float32, -bound, bound)
        return w, b

    keys = jax.random.split(key, 5)
    w1, b1 = linear(keys[0], input_dim, hidden_dim)
    w2, b2 = linear(keys[1], hidden_dim, hidden_dim)
    w3, b3 = linear(keys[2], hidden_dim, hidden_dim)
    wm, bm = linear(keys[3], hidden_dim, output_dim)
    wv, bv = linear(keys[4], hidden_dim, output_dim)
    return dict(w1=w1, b1=b1, w2=w2, b2=b2, w3=w3, b3=b3,
                wm=wm, bm=bm, wv=wv, bv=bv)


def reference_forward(x, p):
    """Pure-JAX reference for correctness check."""
    def silu(v):
        return v * jax.nn.sigmoid(v)
    h = silu(x @ p["w1"] + p["b1"])
    h = silu(h @ p["w2"] + p["b2"])
    h = silu(h @ p["w3"] + p["b3"])
    mean = h @ p["wm"] + p["bm"]
    var = jax.nn.softplus(h @ p["wv"] + p["bv"]) + 1e-6
    return {"mean": mean, "var": var}


if __name__ == "__main__":
    # small shapes consistent with forward(x: [batch, input_dim])
    batch, input_dim, hidden_dim, output_dim = 8, 32, 32, 1

    key = jax.random.PRNGKey(0)
    kx, kp = jax.random.split(key)
    x = jax.random.normal(kx, (batch, input_dim), jnp.float32)
    params = init_params(kp, input_dim, hidden_dim, output_dim)

    ref = reference_forward(x, params)

    # f32 MXU operands: bitwise-close to the reference.
    out = material_property_predictor(x, params, compute_dtype=jnp.float32)
    jax.block_until_ready(out)
    assert out["mean"].shape == (batch, output_dim)
    assert out["var"].shape == (batch, output_dim)
    assert jnp.allclose(out["mean"], ref["mean"], atol=1e-4, rtol=1e-4)
    assert jnp.allclose(out["var"], ref["var"], atol=1e-4, rtol=1e-4)
    assert bool(jnp.all(out["var"] > 0.0))

    # Default path: bf16 trunk MXU operands + f32 head / accumulation / elementwise.
    out_bf16 = material_property_predictor(x, params)
    jax.block_until_ready(out_bf16)
    assert out_bf16["mean"].shape == (batch, output_dim)
    assert out_bf16["var"].shape == (batch, output_dim)
    assert jnp.allclose(out_bf16["mean"], ref["mean"], atol=1e-1, rtol=1e-1)
    assert bool(jnp.all(out_bf16["var"] > 0.0))
    assert bool(jnp.all(jnp.isfinite(out_bf16["mean"])))
    assert bool(jnp.all(jnp.isfinite(out_bf16["var"])))

    # Non-tile-multiple batch: exercises the row-padding + >=2-step grid path.
    batch2 = 20
    x2 = jax.random.normal(jax.random.PRNGKey(1), (batch2, input_dim), jnp.float32)
    ref2 = reference_forward(x2, params)
    out2 = material_property_predictor(x2, params, compute_dtype=jnp.float32)
    jax.block_until_ready(out2)
    assert out2["mean"].shape == (batch2, output_dim)
    assert jnp.allclose(out2["mean"], ref2["mean"], atol=1e-4, rtol=1e-4)
    assert jnp.allclose(out2["var"], ref2["var"], atol=1e-4, rtol=1e-4)

    print("KERNEL_OK")
</pallas_src>

<mosaic_0001>
module attributes {stable_mosaic.version = 11 : i64} {
  func.func @_mlp_kernel(%arg0: i32, %arg1: memref<8x32xf32, #tpu.memory_space<vmem>>, %arg2: memref<32x128xf32, #tpu.memory_space<vmem>>, %arg3: memref<1x128xf32, #tpu.memory_space<vmem>>, %arg4: memref<128x128xf32, #tpu.memory_space<vmem>>, %arg5: memref<1x128xf32, #tpu.memory_space<vmem>>, %arg6: memref<128x128xf32, #tpu.memory_space<vmem>>, %arg7: memref<1x128xf32, #tpu.memory_space<vmem>>, %arg8: memref<128x128xf32, #tpu.memory_space<vmem>>, %arg9: memref<1x128xf32, #tpu.memory_space<vmem>>, %arg10: memref<8x1xf32, #tpu.memory_space<vmem>>, %arg11: memref<8x1xf32, #tpu.memory_space<vmem>>) attributes {dimension_semantics = [#tpu.dimension_semantics<parallel>], iteration_bounds = array<i64: 1>, scalar_prefetch = 0 : i64, scratch_operands = 0 : i64, tpu.core_type = #tpu.core_type<tc>, window_params = [{transform_indices = @transform_0, window_bounds = array<i64: 8, 32>}, {pipeline_mode = #tpu.pipeline_mode<synchronous>, transform_indices = @transform_1, window_bounds = array<i64: 32, 128>}, {pipeline_mode = #tpu.pipeline_mode<synchronous>, transform_indices = @transform_2, window_bounds = array<i64: 1, 128>}, {pipeline_mode = #tpu.pipeline_mode<synchronous>, transform_indices = @transform_3, window_bounds = array<i64: 128, 128>}, {pipeline_mode = #tpu.pipeline_mode<synchronous>, transform_indices = @transform_4, window_bounds = array<i64: 1, 128>}, {pipeline_mode = #tpu.pipeline_mode<synchronous>, transform_indices = @transform_5, window_bounds = array<i64: 128, 128>}, {pipeline_mode = #tpu.pipeline_mode<synchronous>, transform_indices = @transform_6, window_bounds = array<i64: 1, 128>}, {pipeline_mode = #tpu.pipeline_mode<synchronous>, transform_indices = @transform_7, window_bounds = array<i64: 128, 128>}, {pipeline_mode = #tpu.pipeline_mode<synchronous>, transform_indices = @transform_8, window_bounds = array<i64: 1, 128>}, {transform_indices = @transform_9, window_bounds = array<i64: 8, 1>}, {transform_indices = @transform_10, window_bounds = array<i64: 8, 1>}]} {
    %c0 = arith.constant 0 : index
    %c0_0 = arith.constant 0 : index
    %0 = vector.load %arg1[%c0, %c0_0] : memref<8x32xf32, #tpu.memory_space<vmem>>, vector<8x32xf32>
    %c0_1 = arith.constant 0 : index
    %c0_2 = arith.constant 0 : index
    %1 = vector.load %arg3[%c0_1, %c0_2] : memref<1x128xf32, #tpu.memory_space<vmem>>, vector<1x128xf32>
    %c0_3 = arith.constant 0 : index
    %c0_4 = arith.constant 0 : index
    %2 = vector.load %arg5[%c0_3, %c0_4] : memref<1x128xf32, #tpu.memory_space<vmem>>, vector<1x128xf32>
    %c0_5 = arith.constant 0 : index
    %c0_6 = arith.constant 0 : index
    %3 = vector.load %arg7[%c0_5, %c0_6] : memref<1x128xf32, #tpu.memory_space<vmem>>, vector<1x128xf32>
    %c0_7 = arith.constant 0 : index
    %c0_8 = arith.constant 0 : index
    %4 = vector.load %arg9[%c0_7, %c0_8] : memref<1x128xf32, #tpu.memory_space<vmem>>, vector<1x128xf32>
    %c0_9 = arith.constant 0 : index
    %c0_10 = arith.constant 0 : index
    %5 = vector.load %arg2[%c0_9, %c0_10] : memref<32x128xf32, #tpu.memory_space<vmem>>, vector<32x128xf32>
    %cst = arith.constant dense<0.000000e+00> : vector<8x128xf32>
    %6 = tpu.matmul %0, %5, %cst {dimension_numbers = #tpu.dot_dimension_numbers<[1], [0], [0], [1], [0, 0, 1, 1], [], []>} : vector<8x32xf32>, vector<32x128xf32>, vector<8x128xf32> -> vector<8x128xf32>
    %7 = vector.broadcast %1 : vector<1x128xf32> to vector<8x128xf32>
    %8 = arith.addf %6, %7 : vector<8x128xf32>
    %cst_11 = arith.constant 5.000000e-01 : f32
    %9 = vector.broadcast %cst_11 : f32 to vector<8x128xf32>
    %10 = arith.mulf %9, %8 : vector<8x128xf32>
    %11 = math.tanh %10 : vector<8x128xf32>
    %cst_12 = arith.constant 1.000000e+00 : f32
    %12 = vector.broadcast %cst_12 : f32 to vector<8x128xf32>
    %13 = arith.addf %12, %11 : vector<8x128xf32>
    %cst_13 = arith.constant 5.000000e-01 : f32
    %14 = vector.broadcast %cst_13 : f32 to vector<8x128xf32>
    %15 = arith.mulf %14, %13 : vector<8x128xf32>
    %16 = arith.mulf %8, %15 : vector<8x128xf32>
    %c0_14 = arith.constant 0 : index
    %c0_15 = arith.constant 0 : index
    %17 = vector.load %arg4[%c0_14, %c0_15] : memref<128x128xf32, #tpu.memory_space<vmem>>, vector<128x128xf32>
    %cst_16 = arith.constant dense<0.000000e+00> : vector<8x128xf32>
    %18 = tpu.matmul %16, %17, %cst_16 {dimension_numbers = #tpu.dot_dimension_numbers<[1], [0], [0], [1], [0, 0, 1, 1], [], []>} : vector<8x128xf32>, vector<128x128xf32>, vector<8x128xf32> -> vector<8x128xf32>
    %19 = vector.broadcast %2 : vector<1x128xf32> to vector<8x128xf32>
    %20 = arith.addf %18, %19 : vector<8x128xf32>
    %cst_17 = arith.constant 5.000000e-01 : f32
    %21 = vector.broadcast %cst_17 : f32 to vector<8x128xf32>
    %22 = arith.mulf %21, %20 : vector<8x128xf32>
    %23 = math.tanh %22 : vector<8x128xf32>
    %cst_18 = arith.constant 1.000000e+00 : f32
    %24 = vector.broadcast %cst_18 : f32 to vector<8x128xf32>
    %25 = arith.addf %24, %23 : vector<8x128xf32>
    %cst_19 = arith.constant 5.000000e-01 : f32
    %26 = vector.broadcast %cst_19 : f32 to vector<8x128xf32>
    %27 = arith.mulf %26, %25 : vector<8x128xf32>
    %28 = arith.mulf %20, %27 : vector<8x128xf32>
    %c0_20 = arith.constant 0 : index
    %c0_21 = arith.constant 0 : index
    %29 = vector.load %arg6[%c0_20, %c0_21] : memref<128x128xf32, #tpu.memory_space<vmem>>, vector<128x128xf32>
    %cst_22 = arith.constant dense<0.000000e+00> : vector<8x128xf32>
    %30 = tpu.matmul %28, %29, %cst_22 {dimension_numbers = #tpu.dot_dimension_numbers<[1], [0], [0], [1], [0, 0, 1, 1], [], []>} : vector<8x128xf32>, vector<128x128xf32>, vector<8x128xf32> -> vector<8x128xf32>
    %31 = vector.broadcast %3 : vector<1x128xf32> to vector<8x128xf32>
    %32 = arith.addf %30, %31 : vector<8x128xf32>
    %cst_23 = arith.constant 5.000000e-01 : f32
    %33 = vector.broadcast %cst_23 : f32 to vector<8x128xf32>
    %34 = arith.mulf %33, %32 : vector<8x128xf32>
    %35 = math.tanh %34 : vector<8x128xf32>
    %cst_24 = arith.constant 1.000000e+00 : f32
    %36 = vector.broadcast %cst_24 : f32 to vector<8x128xf32>
    %37 = arith.addf %36, %35 : vector<8x128xf32>
    %cst_25 = arith.constant 5.000000e-01 : f32
    %38 = vector.broadcast %cst_25 : f32 to vector<8x128xf32>
    %39 = arith.mulf %38, %37 : vector<8x128xf32>
    %40 = arith.mulf %32, %39 : vector<8x128xf32>
    %c0_26 = arith.constant 0 : index
    %c0_27 = arith.constant 0 : index
    %41 = vector.load %arg8[%c0_26, %c0_27] : memref<128x128xf32, #tpu.memory_space<vmem>>, vector<128x128xf32>
    %cst_28 = arith.constant dense<0.000000e+00> : vector<8x128xf32>
    %42 = tpu.matmul %40, %41, %cst_28 {dimension_numbers = #tpu.dot_dimension_numbers<[1], [0], [0], [1], [0, 0, 1, 1], [], []>} : vector<8x128xf32>, vector<128x128xf32>, vector<8x128xf32> -> vector<8x128xf32>
    %43 = vector.broadcast %4 : vector<1x128xf32> to vector<8x128xf32>
    %44 = arith.addf %42, %43 : vector<8x128xf32>
    %45 = vector.extract_strided_slice %44 {offsets = [0, 0], sizes = [8, 1], strides = [1, 1]} : vector<8x128xf32> to vector<8x1xf32>
    %46 = vector.extract_strided_slice %44 {offsets = [0, 1], sizes = [8, 1], strides = [1, 1]} : vector<8x128xf32> to vector<8x1xf32>
    %cst_29 = arith.constant 0.000000e+00 : f32
    %47 = vector.broadcast %cst_29 : f32 to vector<8x1xf32>
    %48 = arith.maximumf %46, %47 : vector<8x1xf32>
    %49 = math.absf %46 : vector<8x1xf32>
    %cst_30 = arith.constant 0.000000e+00 : f32
    %50 = vector.broadcast %cst_30 : f32 to vector<8x1xf32>
    %51 = arith.subf %50, %49 : vector<8x1xf32>
    %52 = math.exp %51 : vector<8x1xf32>
    %53 = math.log1p %52 : vector<8x1xf32>
    %54 = arith.addf %48, %53 : vector<8x1xf32>
    %cst_31 = arith.constant 9.99999997E-7 : f32
    %55 = vector.broadcast %cst_31 : f32 to vector<8x1xf32>
    %56 = arith.addf %54, %55 : vector<8x1xf32>
    %c0_32 = arith.constant 0 : index
    %c0_33 = arith.constant 0 : index
    %57 = vector.load %arg10[%c0_32, %c0_33] : memref<8x1xf32, #tpu.memory_space<vmem>>, vector<8x1xf32>
    tpu.vector_store %arg10[%c0_32, %c0_33], %45 {strides = array<i32>} : memref<8x1xf32, #tpu.memory_space<vmem>>, vector<8x1xf32>,
    %c0_34 = arith.constant 0 : index
    %c0_35 = arith.constant 0 : index
    %58 = vector.load %arg11[%c0_34, %c0_35] : memref<8x1xf32, #tpu.memory_space<vmem>>, vector<8x1xf32>
    tpu.vector_store %arg11[%c0_34, %c0_35], %56 {strides = array<i32>} : memref<8x1xf32, #tpu.memory_space<vmem>>, vector<8x1xf32>,
    return
  }
  func.func @transform_0(%arg0: i32) -> (i32, i32) {
    %c0_i32 = arith.constant 0 : i32
    %c0_i32_0 = arith.constant 0 : i32
    return %arg0, %c0_i32 : i32, i32
  }
  func.func @transform_1(%arg0: i32) -> (i32, i32) {
    %c0_i32 = arith.constant 0 : i32
    %c0_i32_0 = arith.constant 0 : i32
    %c0_i32_1 = arith.constant 0 : i32
    return %c0_i32, %c0_i32_0 : i32, i32
  }
  func.func @transform_2(%arg0: i32) -> (i32, i32) {
    %c0_i32 = arith.constant 0 : i32
    %c0_i32_0 = arith.constant 0 : i32
    %c0_i32_1 = arith.constant 0 : i32
    return %c0_i32, %c0_i32_0 : i32, i32
  }
  func.func @transform_3(%arg0: i32) -> (i32, i32) {
    %c0_i32 = arith.constant 0 : i32
    %c0_i32_0 = arith.constant 0 : i32
    %c0_i32_1 = arith.constant 0 : i32
    return %c0_i32, %c0_i32_0 : i32, i32
  }
  func.func @transform_4(%arg0: i32) -> (i32, i32) {
    %c0_i32 = arith.constant 0 : i32
    %c0_i32_0 = arith.constant 0 : i32
    %c0_i32_1 = arith.constant 0 : i32
    return %c0_i32, %c0_i32_0 : i32, i32
  }
  func.func @transform_5(%arg0: i32) -> (i32, i32) {
    %c0_i32 = arith.constant 0 : i32
    %c0_i32_0 = arith.constant 0 : i32
    %c0_i32_1 = arith.constant 0 : i32
    return %c0_i32, %c0_i32_0 : i32, i32
  }
  func.func @transform_6(%arg0: i32) -> (i32, i32) {
    %c0_i32 = arith.constant 0 : i32
    %c0_i32_0 = arith.constant 0 : i32
    %c0_i32_1 = arith.constant 0 : i32
    return %c0_i32, %c0_i32_0 : i32, i32
  }
  func.func @transform_7(%arg0: i32) -> (i32, i32) {
    %c0_i32 = arith.constant 0 : i32
    %c0_i32_0 = arith.constant 0 : i32
    %c0_i32_1 = arith.constant 0 : i32
    return %c0_i32, %c0_i32_0 : i32, i32
  }
  func.func @transform_8(%arg0: i32) -> (i32, i32) {
    %c0_i32 = arith.constant 0 : i32
    %c0_i32_0 = arith.constant 0 : i32
    %c0_i32_1 = arith.constant 0 : i32
    return %c0_i32, %c0_i32_0 : i32, i32
  }
  func.func @transform_9(%arg0: i32) -> (i32, i32) {
    %c0_i32 = arith.constant 0 : i32
    %c0_i32_0 = arith.constant 0 : i32
    return %arg0, %c0_i32 : i32, i32
  }
  func.func @transform_10(%arg0: i32) -> (i32, i32) {
    %c0_i32 = arith.constant 0 : i32
    %c0_i32_0 = arith.constant 0 : i32
    return %arg0, %c0_i32 : i32, i32
  }
}

</mosaic_0001>

<bundles_post_ra>
// kernel: tpu_custom_call.1
= control target key start
LH: loop header
LB: loop body
LE: loop exit
PB: predicated region body
PF: predicated region fallthrough
CT: control target
= control target key end

     0   :  { %16 = vsyncpa [#allocation3], 0  ;;  %s989_s0 = inlined_call_operand.hbm [shape: f32[8,32], index: 0, kind: input, shape index: {}]   ;;  %s990_s1 = inlined_call_operand.hbm [shape: f32[32,128], index: 1, kind: input, shape index: {}]   ;;  %s991_s2 = inlined_call_operand.vmem [shape: f32[1,128], index: 2, kind: input, shape index: {}]   ;;  %s992_s3 = inlined_call_operand.hbm [shape: f32[128,128], index: 3, kind: input, shape index: {}]   ;;  %s993_s4 = inlined_call_operand.vmem [shape: f32[1,128], index: 4, kind: input, shape index: {}]   ;;  %s994_s5 = inlined_call_operand.hbm [shape: f32[128,128], index: 5, kind: input, shape index: {}]   ;;  %s995_s6 = inlined_call_operand.vmem [shape: f32[1,128], index: 6, kind: input, shape index: {}]   ;;  %s996_s7 = inlined_call_operand.hbm [shape: f32[128,128], index: 7, kind: input, shape index: {}]   ;;  %s997_s8 = inlined_call_operand.vmem [shape: f32[1,128], index: 8, kind: input, shape index: {}]   ;;  %s998_s9 = inlined_call_operand.vmem [shape: f32[8,1], index: 9, kind: output, shape index: {0}]   ;;  %s999_s10 = inlined_call_operand.vmem [shape: f32[8,1], index: 10, kind: output, shape index: {1}]  }
   0x1   :  { %17 = vsyncpa [#allocation5], 0 }
   0x2   :  { %18 = vsyncpa [#allocation8], 0  ;;  %s817_s13 = smov [#allocation4]  }
   0x3   :  { %s34_s14 = sshll.u32 %s817_s13, 4  ;;  %s35_s14 = int_to_ptr.vmem [resolvable:$true] %s34_s14 }
   0x4   :  { %s719_s15 = scalar_lea.vmem %s35_s14, 512  ;;  %p724_p1 = scmp.lt.s32.totalorder %s35_s14, %s35_s14 }
   0x5   :  { %p720_p0 = scmp.ne.s32.totalorder %s35_s14, %s719_s15  ;;  %p725_p2 = scmp.lt.s32.totalorder %s719_s15, %s719_s15 }
   0x7   :  { %p726_p3 = por %p725_p2, %p724_p1 }
   0x9   :  { %p727_p4 = pnand %p726_p3, %p720_p0 }
   0xb   :  { %730 = shalt.err (!%p727_p4)
}
   0xc   :  { %s818_s16 = smov 128   ;;  %s819_s17 = smov 8  }
   0xd   :  { %40 = dma.hbm_to_vmem [thread:$0]  %s990_s1, 512, %s35_s14, [#allocation5], %s818_s16, %s818_s16, %s819_s17  }
   0xe   :  { %s820_s20 = smov [#allocation7]   ;;  %s821_s22 = smov [#allocation2]  }
   0xf   :  { %s62_s21 = sshll.u32 %s820_s20, 4  ;;  %s25_s23 = sshll.u32 %s821_s22, 4  ;;  %s63_s21 = int_to_ptr.vmem [resolvable:$true] %s62_s21  ;;  %s26_s23 = int_to_ptr.vmem [resolvable:$true] %s25_s23 }
  0x10   :  { %s739_s24 = scalar_lea.vmem %s63_s21, 2048  ;;  %p744_p6 = scmp.lt.s32.totalorder %s63_s21, %s63_s21 }
  0x11   :  { %p740_p5 = scmp.ne.s32.totalorder %s63_s21, %s739_s24  ;;  %p745_p7 = scmp.lt.s32.totalorder %s739_s24, %s739_s24 }
  0x13   :  { %p746_p8 = por %p745_p7, %p744_p6 }
  0x15   :  { %p747_p9 = pnand %p746_p8, %p740_p5 }
  0x17   :  { %750 = shalt.err (!%p747_p9)
}
  0x18   :  { %68 = dma.hbm_to_vmem [thread:$0]  %s994_s5, 2048, %s63_s21, [#allocation8], %s818_s16, %s818_s16, %s819_s17  }
  0x19   :  { %s759_s1 = scalar_lea.vmem %s26_s23, 128  ;;  %p764_p11 = scmp.lt.s32.totalorder %s26_s23, %s26_s23 }
  0x1a   :  { %p760_p10 = scmp.ne.s32.totalorder %s26_s23, %s759_s1  ;;  %p765_p12 = scmp.lt.s32.totalorder %s759_s1, %s759_s1 }
  0x1c   :  { %p766_p13 = por %p765_p12, %p764_p11 }
  0x1e   :  { %p767_p0 = pnand %p766_p13, %p760_p10 }
  0x20   :  { %770 = shalt.err (!%p767_p0)
}
  0x21   :  { %28 = dma.hbm_to_vmem [thread:$0]  %s989_s0, 128, %s26_s23, [#allocation3]  }
  0x22   :  { %s822_s29 = smov [#allocation6]   ;;  %s823_s11 = smov [#allocation9]  }
  0x23   :  { %s48_s30 = sshll.u32 %s822_s29, 4  ;;  %s76_s12 = sshll.u32 %s823_s11, 4  ;;  %s49_s30 = int_to_ptr.vmem [resolvable:$true] %s48_s30  ;;  %s77_s12 = int_to_ptr.vmem [resolvable:$true] %s76_s12 }
  0x24   :  { %s779_s13 = scalar_lea.vmem %s49_s30, 2048  ;;  %p784_p2 = scmp.lt.s32.totalorder %s49_s30, %s49_s30 }
  0x25   :  { %p780_p1 = scmp.ne.s32.totalorder %s49_s30, %s779_s13  ;;  %p785_p3 = scmp.lt.s32.totalorder %s779_s13, %s779_s13 }
  0x27   :  { %p786_p4 = por %p785_p3, %p784_p2 }
  0x29   :  { %p787_p5 = pnand %p786_p4, %p780_p1 }
  0x2b   :  { %790 = shalt.err (!%p787_p5)
}
  0x2c   :  { %54 = dma.hbm_to_vmem [thread:$0]  %s992_s3, 2048, %s49_s30, [#allocation5], %s818_s16, %s818_s16, %s819_s17  }
  0x2d   :  { %s799_s0 = scalar_lea.vmem %s77_s12, 2048  ;;  %p804_p7 = scmp.lt.s32.totalorder %s77_s12, %s77_s12 }
  0x2e   :  { %p800_p6 = scmp.ne.s32.totalorder %s77_s12, %s799_s0  ;;  %p805_p8 = scmp.lt.s32.totalorder %s799_s0, %s799_s0 }
  0x30   :  { %p806_p9 = por %p805_p8, %p804_p7 }
  0x32   :  { %p807_p10 = pnand %p806_p9, %p800_p6 }
  0x34   :  { %810 = shalt.err (!%p807_p10)
}
  0x35   :  { %82 = dma.hbm_to_vmem [thread:$0]  %s996_s7, 2048, %s77_s12, [#allocation8], %s818_s16, %s818_s16, %s819_s17  }
  0x36   :  { %811 = dma.done.wait [#allocation3], 128  }
  0x37   :  { %812 = vsyncadd [#allocation3], 4294967168 }
  0x38   :  { %813 = dma.done.wait [#allocation5], 2560  }
  0x39   :  { %814 = vsyncadd [#allocation5], 4294964736 }
  0x3a   :  { %815 = dma.done.wait [#allocation8], 4096  }
  0x3b   :  { %816 = vsyncadd [#allocation8], 4294963200  ;;  %v824_v0 = vmov 0.0   ;;  %vm825_vm0 = vmmov 0   ;;  %v108_v1 = vld [vmem:[#allocation4 + $0x18] sm:$0xff]  ;;  %v107_v2 = vld [vmem:[#allocation4 + $0x10] sm:$0xff] }
  0x3c   :  { %575 = vmatprep.subr.mxu0 %v824_v0  ;;  %583 = vmatprep.mubr.msk.f32.mxu0 %vm825_vm0, %v824_v0  ;;  %v209_v3 = vld [vmem:[#allocation6 + $0x78] sm:$0xff]  ;;  %v106_v4 = vld [vmem:[#allocation4 + $0x8] sm:$0xff]  ;;  %v208_v5 = vld [vmem:[#allocation6 + $0x70] sm:$0xff]  ;;  %vm115_vm1 = vcmask 261120   ;;  %vm496_vm2 = vcmask 7168  }
  0x3d   :  { %586 = vmatprep.subr.mxu1 %v824_v0  ;;  %618 = vmatprep.mubr.msk.f32.mxu1 %vm825_vm0, %v824_v0  ;;  %v207_v6 = vld [vmem:[#allocation6 + $0x68] sm:$0xff]  ;;  %v105_v7 = vld [vmem:[#allocation4] sm:$0xff]  ;;  %v100_v8 = vld [vmem:[#allocation2] sm:$0xff] }
  0x3e   :  { %576 = vmatpush3.msra.mxu0 %v108_v1  ;;  %587 = vmatpush3.msra.mxu1 %v209_v3  ;;  %v206_v9 = vld [vmem:[#allocation6 + $0x60] sm:$0xff]  ;;  %v205_v10 = vld [vmem:[#allocation6 + $0x58] sm:$0xff]  ;;  %v204_v11 = vld [vmem:[#allocation6 + $0x50] sm:$0xff] }
  0x3f   :  { %577 = vmatprep.subr.mxu0 %v824_v0  ;;  %588 = vmatprep.subr.mxu1 %v824_v0  ;;  %v203_v12 = vld [vmem:[#allocation6 + $0x48] sm:$0xff]  ;;  %v202_v13 = vld [vmem:[#allocation6 + $0x40] sm:$0xff]  ;;  %v201_v14 = vld [vmem:[#allocation6 + $0x38] sm:$0xff] }
  0x40   :  { %578 = vmatpush3.msra.mxu0 %v107_v2  ;;  %589 = vmatpush3.msra.mxu1 %v208_v5  ;;  %v200_v15 = vld [vmem:[#allocation6 + $0x30] sm:$0xff]  ;;  %v199_v16 = vld [vmem:[#allocation6 + $0x28] sm:$0xff]  ;;  %v198_v17 = vld [vmem:[#allocation6 + $0x20] sm:$0xff] }
  0x41   :  { %579 = vmatprep.subr.mxu0 %v824_v0  ;;  %590 = vmatprep.subr.mxu1 %v824_v0  ;;  %v197_v18 = vld [vmem:[#allocation6 + $0x18] sm:$0xff]  ;;  %v196_v19 = vld [vmem:[#allocation6 + $0x10] sm:$0xff]  ;;  %v195_v20 = vld [vmem:[#allocation6 + $0x8] sm:$0xff] }
  0x42   :  { %580 = vmatpush3.msra.mxu0 %v106_v4  ;;  %591 = vmatpush3.msra.mxu1 %v207_v6  ;;  %v194_v21 = vld [vmem:[#allocation6] sm:$0xff]  ;;  %v306_v22 = vld [vmem:[#allocation7 + $0x78] sm:$0xff]  ;;  %v305_v23 = vld [vmem:[#allocation7 + $0x70] sm:$0xff] }
  0x43   :  { %581 = vmatprep.subr.mxu0 %v824_v0  ;;  %592 = vmatprep.subr.mxu1 %v824_v0  ;;  %v304_v24 = vld [vmem:[#allocation7 + $0x68] sm:$0xff]  ;;  %v514_v25 = vld [vmem:[%s991_s2] ss:$0 sm:$0xff]  ;;  %v303_v34 = vld [vmem:[#allocation7 + $0x60] sm:$0xff] }
  0x44   :  { %582 = vmatpush3.msra.mxu0 %v105_v7  ;;  %593 = vmatpush3.msra.mxu1 %v206_v9  ;;  %v302_v35 = vld [vmem:[#allocation7 + $0x58] sm:$0xff]  ;;  %v301_v36 = vld [vmem:[#allocation7 + $0x50] sm:$0xff]  ;;  %v300_v37 = vld [vmem:[#allocation7 + $0x48] sm:$0xff] }
  0x45   :  { %584 = vmatmul.mubr.msk.f32.vlgmr.msra.gmra.mxu0 %vm115_vm1, %v100_v8  ;;  %621 = vmatprep.subr.mxu0 %v824_v0  ;;  %v299_v38 = vld [vmem:[#allocation7 + $0x40] sm:$0xff]  ;;  %v298_v39 = vld [vmem:[#allocation7 + $0x38] sm:$0xff]  ;;  %v297_v40 = vld [vmem:[#allocation7 + $0x30] sm:$0xff] }
  0x46   :  { %653 = vmatprep.mubr.msk.f32.mxu0 %vm825_vm0, %v824_v0  ;;  %594 = vmatprep.subr.mxu1 %v824_v0  ;;  %v296_v41 = vld [vmem:[#allocation7 + $0x28] sm:$0xff]  ;;  %v295_v42 = vld [vmem:[#allocation7 + $0x20] sm:$0xff]  ;;  %v294_v43 = vld [vmem:[#allocation7 + $0x18] sm:$0xff] }
  0x47   :  { %595 = vmatpush3.msra.mxu1 %v205_v10  ;;  %622 = vmatpush3.msra.mxu0 %v306_v22  ;;  %v293_v44 = vld [vmem:[#allocation7 + $0x10] sm:$0xff]  ;;  %v292_v45 = vld [vmem:[#allocation7 + $0x8] sm:$0xff]  ;;  %v291_v46 = vld [vmem:[#allocation7] sm:$0xff] }
  0x48   :  { %596 = vmatprep.subr.mxu1 %v824_v0  ;;  %623 = vmatprep.subr.mxu0 %v824_v0  ;;  %v403_v47 = vld [vmem:[#allocation9 + $0x78] sm:$0xff]  ;;  %v402_v48 = vld [vmem:[#allocation9 + $0x70] sm:$0xff]  ;;  %v401_v49 = vld [vmem:[#allocation9 + $0x68] sm:$0xff] }
  0x49   :  { %597 = vmatpush3.msra.mxu1 %v204_v11  ;;  %624 = vmatpush3.msra.mxu0 %v305_v23  ;;  %v516_v50 = vld [vmem:[%s993_s4] ss:$0 sm:$0xff]  ;;  %v400_v59 = vld [vmem:[#allocation9 + $0x60] sm:$0xff]  ;;  %v398_v61 = vld [vmem:[#allocation9 + $0x50] sm:$0xff] }
  0x4a   :  { %598 = vmatprep.subr.mxu1 %v824_v0  ;;  %625 = vmatprep.subr.mxu0 %v824_v0  ;;  %v399_v60 = vld [vmem:[#allocation9 + $0x58] sm:$0xff]  ;;  %v397_v62 = vld [vmem:[#allocation9 + $0x48] sm:$0xff]  ;;  %v396_v63 = vld [vmem:[#allocation9 + $0x40] sm:$0xff] }
  0x4b   :  { %599 = vmatpush3.msra.mxu1 %v203_v12  ;;  %626 = vmatpush3.msra.mxu0 %v304_v24  ;;  %v395_v1 = vld [vmem:[#allocation9 + $0x38] sm:$0xff]  ;;  %v394_v2 = vld [vmem:[#allocation9 + $0x30] sm:$0xff]  ;;  %v393_v3 = vld [vmem:[#allocation9 + $0x28] sm:$0xff] }
  0x4c   :  { %600 = vmatprep.subr.mxu1 %v824_v0  ;;  %627 = vmatprep.subr.mxu0 %v824_v0  ;;  %v392_v4 = vld [vmem:[#allocation9 + $0x20] sm:$0xff]  ;;  %v391_v5 = vld [vmem:[#allocation9 + $0x18] sm:$0xff]  ;;  %v390_v6 = vld [vmem:[#allocation9 + $0x10] sm:$0xff] }
  0x4d   :  { %601 = vmatpush3.msra.mxu1 %v202_v13  ;;  %628 = vmatpush3.msra.mxu0 %v303_v34  ;;  %v389_v7 = vld [vmem:[#allocation9 + $0x8] sm:$0xff]  ;;  %v388_v8 = vld [vmem:[#allocation9] sm:$0xff]  ;;  %v517_v9 = vld [vmem:[%s995_s6] ss:$0 sm:$0xff] }
  0x4e   :  { %602 = vmatprep.subr.mxu1 %v824_v0  ;;  %629 = vmatprep.subr.mxu0 %v824_v0 }
  0x4f   :  { %603 = vmatpush3.msra.mxu1 %v201_v14  ;;  %630 = vmatpush3.msra.mxu0 %v302_v35 }
  0x50   :  { %604 = vmatprep.subr.mxu1 %v824_v0  ;;  %631 = vmatprep.subr.mxu0 %v824_v0 }
  0x51   :  { %605 = vmatpush3.msra.mxu1 %v200_v15  ;;  %632 = vmatpush3.msra.mxu0 %v301_v36 }
  0x52   :  { %606 = vmatprep.subr.mxu1 %v824_v0  ;;  %633 = vmatprep.subr.mxu0 %v824_v0 }
  0x53   :  { %607 = vmatpush3.msra.mxu1 %v199_v16  ;;  %634 = vmatpush3.msra.mxu0 %v300_v37 }
  0x54   :  { %608 = vmatprep.subr.mxu1 %v824_v0  ;;  %635 = vmatprep.subr.mxu0 %v824_v0 }
  0x55   :  { %609 = vmatpush3.msra.mxu1 %v198_v17  ;;  %636 = vmatpush3.msra.mxu0 %v299_v38 }
  0x56   :  { %610 = vmatprep.subr.mxu1 %v824_v0  ;;  %637 = vmatprep.subr.mxu0 %v824_v0 }
  0x57   :  { %611 = vmatpush3.msra.mxu1 %v197_v18  ;;  %638 = vmatpush3.msra.mxu0 %v298_v39 }
  0x58   :  { %612 = vmatprep.subr.mxu1 %v824_v0  ;;  %639 = vmatprep.subr.mxu0 %v824_v0 }
  0x59   :  { %613 = vmatpush3.msra.mxu1 %v196_v19  ;;  %640 = vmatpush3.msra.mxu0 %v297_v40 }
  0x5a   :  { %614 = vmatprep.subr.mxu1 %v824_v0  ;;  %641 = vmatprep.subr.mxu0 %v824_v0 }
  0x5b   :  { %615 = vmatpush3.msra.mxu1 %v195_v20  ;;  %642 = vmatpush3.msra.mxu0 %v296_v41 }
  0x5c   :  { %616 = vmatprep.subr.mxu1 %v824_v0  ;;  %643 = vmatprep.subr.mxu0 %v824_v0 }
  0x5d   :  { %617 = vmatpush3.msra.mxu1 %v194_v21  ;;  %644 = vmatpush3.msra.mxu0 %v295_v42 }
  0x5e   :  { %656 = vmatprep.subr.mxu1 %v824_v0  ;;  %645 = vmatprep.subr.mxu0 %v824_v0 }
  0x5f   :  { %646 = vmatpush3.msra.mxu0 %v294_v43 }
  0x60   :  { %647 = vmatprep.subr.mxu0 %v824_v0 }
  0x61   :  { %648 = vmatpush3.msra.mxu0 %v293_v44 }
  0x62   :  { %649 = vmatprep.subr.mxu0 %v824_v0 }
  0x63   :  { %650 = vmatpush3.msra.mxu0 %v292_v45 }
  0x64   :  { %651 = vmatprep.subr.mxu0 %v824_v0 }
  0x65   :  { %652 = vmatpush3.msra.mxu0 %v291_v46 }
 0x105   :  { %v185_v26 = vpop.f32.mrf.mxu0 }
 0x106   :  { %v186_v27 = vadd.f32 %v514_v25, %v185_v26 }
 0x107   :  { %v585_v28 = vpop.f32.mrf.mxu0 }
 0x108   :  { %v189_v29 = vmul.f32 0.5, %v186_v27 }
 0x10a   :  { %701 = vtanh.f32 %v189_v29 }
 0x117   :  { %v702_v30 = vpop.eup %701 }
 0x118   :  { %v191_v31 = vadd.f32 1.0, %v702_v30 }
 0x11a   :  { %v192_v32 = vmul.f32 0.5, %v191_v31 }
 0x11c   :  { %v193_v33 = vmul.f32 %v192_v32, %v186_v27 }
 0x11e   :  { %619 = vmatmul.mubr.f32.vlgmr.msra.gmra.mxu1 %v193_v33 }
 0x11f   :  { %688 = vmatprep.mubr.msk.f32.mxu1 %vm825_vm0, %v824_v0  ;;  %657 = vmatpush3.msra.mxu1 %v403_v47 }
 0x120   :  { %658 = vmatprep.subr.mxu1 %v824_v0 }
 0x121   :  { %659 = vmatpush3.msra.mxu1 %v402_v48 }
 0x122   :  { %660 = vmatprep.subr.mxu1 %v824_v0 }
 0x123   :  { %661 = vmatpush3.msra.mxu1 %v401_v49 }
 0x124   :  { %662 = vmatprep.subr.mxu1 %v824_v0 }
 0x125   :  { %663 = vmatpush3.msra.mxu1 %v400_v59 }
 0x126   :  { %664 = vmatprep.subr.mxu1 %v824_v0 }
 0x127   :  { %665 = vmatpush3.msra.mxu1 %v399_v60 }
 0x128   :  { %666 = vmatprep.subr.mxu1 %v824_v0 }
 0x129   :  { %667 = vmatpush3.msra.mxu1 %v398_v61 }
 0x12a   :  { %668 = vmatprep.subr.mxu1 %v824_v0 }
 0x12b   :  { %669 = vmatpush3.msra.mxu1 %v397_v62 }
 0x12c   :  { %670 = vmatprep.subr.mxu1 %v824_v0 }
 0x12d   :  { %671 = vmatpush3.msra.mxu1 %v396_v63 }
 0x12e   :  { %672 = vmatprep.subr.mxu1 %v824_v0 }
 0x12f   :  { %673 = vmatpush3.msra.mxu1 %v395_v1 }
 0x130   :  { %674 = vmatprep.subr.mxu1 %v824_v0 }
 0x131   :  { %675 = vmatpush3.msra.mxu1 %v394_v2 }
 0x132   :  { %676 = vmatprep.subr.mxu1 %v824_v0 }
 0x133   :  { %677 = vmatpush3.msra.mxu1 %v393_v3 }
 0x134   :  { %678 = vmatprep.subr.mxu1 %v824_v0 }
 0x135   :  { %679 = vmatpush3.msra.mxu1 %v392_v4 }
 0x136   :  { %680 = vmatprep.subr.mxu1 %v824_v0 }
 0x137   :  { %681 = vmatpush3.msra.mxu1 %v391_v5 }
 0x138   :  { %682 = vmatprep.subr.mxu1 %v824_v0 }
 0x139   :  { %683 = vmatpush3.msra.mxu1 %v390_v6 }
 0x13a   :  { %684 = vmatprep.subr.mxu1 %v824_v0 }
 0x13b   :  { %685 = vmatpush3.msra.mxu1 %v389_v7 }
 0x13c   :  { %686 = vmatprep.subr.mxu1 %v824_v0  ;;  %v518_v0 = vld [vmem:[%s997_s8] ss:$0 sm:$0xff]  ;;  %s826_s8 = smov 127  }
 0x13d   :  { %687 = vmatpush3.msra.mxu1 %v388_v8 }
 0x1de   :  { %v282_v51 = vpop.f32.mrf.mxu1 }
 0x1df   :  { %v283_v52 = vadd.f32 %v516_v50, %v282_v51 }
 0x1e0   :  { %v620_v53 = vpop.f32.mrf.mxu1 }
 0x1e1   :  { %v286_v54 = vmul.f32 0.5, %v283_v52 }
 0x1e3   :  { %703 = vtanh.f32 %v286_v54 }
 0x1f0   :  { %v704_v55 = vpop.eup %703 }
 0x1f1   :  { %v288_v56 = vadd.f32 1.0, %v704_v55 }
 0x1f3   :  { %v289_v57 = vmul.f32 0.5, %v288_v56 }
 0x1f5   :  { %v290_v58 = vmul.f32 %v289_v57, %v283_v52 }
 0x1f7   :  { %654 = vmatmul.mubr.f32.vlgmr.msra.gmra.mxu0 %v290_v58 }
 0x2b7   :  { %v379_v10 = vpop.f32.mrf.mxu0 }
 0x2b8   :  { %v380_v11 = vadd.f32 %v517_v9, %v379_v10 }
 0x2b9   :  { %v655_v12 = vpop.f32.mrf.mxu0 }
 0x2ba   :  { %v383_v13 = vmul.f32 0.5, %v380_v11 }
 0x2bc   :  { %705 = vtanh.f32 %v383_v13 }
 0x2c9   :  { %v706_v14 = vpop.eup %705 }
 0x2ca   :  { %v385_v15 = vadd.f32 1.0, %v706_v14 }
 0x2cc   :  { %v386_v16 = vmul.f32 0.5, %v385_v15 }
 0x2ce   :  { %v387_v17 = vmul.f32 %v386_v16, %v380_v11 }
 0x2d0   :  { %689 = vmatmul.mubr.f32.vlgmr.msra.gmra.mxu1 %v387_v17 }
 0x390   :  { %v476_v18 = vpop.f32.mrf.mxu1 }
 0x391   :  { %v477_v19 = vadd.f32 %v518_v0, %v476_v18 }
 0x392   :  { %v690_v20 = vpop.f32.mrf.mxu1 }
 0x393   :  { %v481_v21 = vand.u32 2147483647, %v477_v19  ;;  %497 = vst.msk [vmem:[%s998_s9] sm:$0xff] %vm496_vm2, %v477_v19  ;;  %v480_v32 = vmax.f32 %v477_v19, 0.0 }
 0x395   :  { %v482_v22 = vsub.f32 0.0, %v481_v21 }
 0x397   :  { %v483_v23 = vmul.f32 1.442695, %v482_v22 }
 0x399   :  { %707 = vpow2.f32 %v483_v23 }
 0x3a6   :  { %v708_v24 = vpop.eup %707 }
 0x3a7   :  { %v485_v25 = vadd.f32 1.0, %v708_v24  ;;  %v488_v26 = vmul.f32 -0.5, %v708_v24  ;;  %v491_v28 = vand.u32 2147483647, %v708_v24 }
 0x3a9   :  { %709 = vlog2.f32 %v485_v25  ;;  %v489_v27 = vadd.f32 1.0, %v488_v26  ;;  %vm492_vm3 = vcmp.lt.f32.partialorder %v491_v28, 0.0004427343 }
 0x3ab   :  { %v490_v31 = vmul.f32 %v708_v24, %v489_v27 }
 0x3b6   :  { %v710_v29 = vpop.eup %709 }
 0x3b7   :  { %v487_v30 = vmul.f32 0.6931472, %v710_v29 }
 0x3b9   :  { %v493_v33 = vsel %vm492_vm3, %v490_v31, %v487_v30 }
 0x3ba   :  { %v494_v34 = vadd.f32 %v493_v33, %v480_v32 }
 0x3bc   :  { %v495_v35 = vadd.f32 1e-06, %v494_v34 }
 0x3be   :  { %499 = vrot.lane.b32.xlu0 %v495_v35, %s826_s8 }
 0x430   :  { %v500_v36 = vpop.permute.xlu0 %499 }
 0x431   :  { %502 = vst.msk [vmem:[%s999_s10] sm:$0xff] %vm496_vm2, %v500_v36 }
 0x432   :  { %511 = vsyncpa [#allocation3], 1 }
 0x433   :  { %512 = vsyncpa [#allocation5], 1 }
 0x434   :  { %513 = vsyncpa [#allocation8], 1 }

</bundles_post_ra>
